<compile_context>
chip_gen: v7x
topology: tpu7x:2x2x1
jax: 0.10.0
libtpu: 0.0.40
codegen_flags: <defaults>
</compile_context>

<pallas_src>
import functools

import jax
import jax.numpy as jnp
from jax import lax
from jax.experimental import pallas as pl
from jax.experimental.pallas import tpu as pltpu

LANES = 128
SUBLANES = 8
CHUNK_ROWS = 256              # in-kernel accumulation chunk (32 vregs / input)
MAX_BLOCK_ROWS = 8192         # 4 MiB f32 per input per pipeline buffer
VMEM_LIMIT_BYTES = 30 << 20   # 3 inputs x 2 buffers x 4 MiB = 24 MiB + headroom


def _round_up(x, m):
    return ((x + m - 1) // m) * m


def _row_alignment(*dtypes):
    """Sublane multiple so sub-32-bit inputs keep their native (k,128) tile."""
    align = SUBLANES
    for dt in dtypes:
        bits = jnp.dtype(dt).itemsize * 8
        align = max(align, SUBLANES * 32 // bits)   # 8 (f32), 16 (bf16), 32 (i8)
    return align


def _chunk_partial(pred_ref, target_ref, mask_ref, row0, chunk_rows,
                   valid_rows=None):
    """(8,128) partial sum of |sigmoid(pred)-target|*mask over one chunk."""
    p = pred_ref[pl.ds(row0, chunk_rows), :].astype(jnp.float32)
    t = target_ref[pl.ds(row0, chunk_rows), :].astype(jnp.float32)
    m = mask_ref[pl.ds(row0, chunk_rows), :].astype(jnp.float32)
    c = jnp.abs(jax.nn.sigmoid(p) - t) * m
    if valid_rows is not None:
        # Boundary chunk: rows >= valid_rows are garbage (past end of slab).
        # Select (not multiply) so NaN/Inf garbage is safe.
        row = lax.broadcasted_iota(jnp.int32, c.shape, 0)
        c = jnp.where(row < valid_rows, c, 0.0)
    # Tile-aligned reshape; sum over the major axis is pure VPU vreg adds.
    return c.reshape(chunk_rows // SUBLANES, SUBLANES, LANES).sum(axis=0)


def _alpha_loss_kernel(pred_ref, target_ref, mask_ref, out_ref, *,
                       block_rows, chunk_rows, n_rows, num_blocks):
    """Writes an (8,128) lane-dense partial sum for this grid step's block."""
    num_chunks = block_rows // chunk_rows
    need_mask = (n_rows % block_rows) != 0          # static
    zeros = jnp.zeros((SUBLANES, LANES), jnp.float32)

    def chunk_body(i, acc):
        r0 = pl.multiple_of(i * chunk_rows, chunk_rows)
        return acc + _chunk_partial(pred_ref, target_ref, mask_ref,
                                    r0, chunk_rows)

    def full_block():
        if num_chunks == 1:
            return _chunk_partial(pred_ref, target_ref, mask_ref, 0, chunk_rows)
        return lax.fori_loop(0, num_chunks, chunk_body, zeros)

    def last_block():
        # Rows actually present in the (partial) last block -- static int.
        valid = n_rows - (num_blocks - 1) * block_rows
        full_chunks = valid // chunk_rows
        tail_rows = valid - full_chunks * chunk_rows
        if full_chunks == 0:
            acc = zeros
        elif full_chunks == 1:
            acc = _chunk_partial(pred_ref, target_ref, mask_ref, 0, chunk_rows)
        else:
            acc = lax.fori_loop(0, full_chunks, chunk_body, zeros)
        if tail_rows > 0:
            acc = acc + _chunk_partial(pred_ref, target_ref, mask_ref,
                                       full_chunks * chunk_rows, chunk_rows,
                                       valid_rows=tail_rows)
        # Chunks fully past n_rows are never read (they contribute exactly 0).
        return acc

    if not need_mask:
        out_ref[...] = full_block()
    elif num_blocks == 1:
        out_ref[...] = last_block()
    else:
        # Boundary masking only runs on the last grid step (pl.when gating);
        # all other blocks stay purely DMA-bound.
        is_last = pl.program_id(0) == num_blocks - 1

        @pl.when(jnp.logical_not(is_last))
        def _():
            out_ref[...] = full_block()

        @pl.when(is_last)
        def _():
            out_ref[...] = last_block()


def _masked_abs_diff_sum(pred, target, mask):
    """Plain-JAX sum for the small (<128 element) ragged tail."""
    p = jax.nn.sigmoid(pred.astype(jnp.float32))
    return jnp.sum(jnp.abs(p - target.astype(jnp.float32))
                   * mask.astype(jnp.float32))


def alpha_loss(pred, target, mask, *, max_block_rows=MAX_BLOCK_ROWS):
    """loss = mean(|sigmoid(pred) - target| * mask), mean over all elements."""
    assert pred.shape == target.shape == mask.shape
    total = int(pred.size)
    if total == 0:
        return jnp.float32(jnp.nan)   # torch.mean of an empty tensor is nan

    # Keep native dtypes; cast per-chunk inside the kernel (free VPU filler).
    pred_f = jnp.ravel(pred)
    target_f = jnp.ravel(target)
    mask_f = jnp.ravel(mask)

    align = _row_alignment(pred.dtype, target.dtype, mask.dtype)

    # 128-element granularity: the slab covers total // 128 full lanes; any
    # non-multiple-of-8 rows are handled by the in-kernel boundary mask.
    # TODO(synk): have the call site pad to a multiple of 128 so the x[:main]
    # slice (a full-array HBM copy) is never emitted.
    main_rows = total // LANES
    main = main_rows * LANES

    partial = jnp.float32(0.0)
    if main_rows > 0:
        max_block_rows = max(align, (max_block_rows // align) * align)
        block_rows = min(max_block_rows, _round_up(main_rows, align))
        if main_rows > 1024:
            # >= 4 grid steps: v7x megacore split + pipeline overlap.
            block_rows = min(block_rows,
                             _round_up(pl.cdiv(main_rows, 4), align))
        if block_rows >= CHUNK_ROWS:
            block_rows = (block_rows // CHUNK_ROWS) * CHUNK_ROWS
            chunk_rows = CHUNK_ROWS
        else:
            chunk_rows = block_rows
        num_blocks = pl.cdiv(main_rows, block_rows)

        def slab(x):
            x = x if main == total else x[:main]
            return x.reshape(main_rows, LANES)

        kernel = functools.partial(
            _alpha_loss_kernel, block_rows=block_rows, chunk_rows=chunk_rows,
            n_rows=main_rows, num_blocks=num_blocks)

        in_spec = pl.BlockSpec((block_rows, LANES), lambda i: (i, 0))
        bytes_in = main * (pred.dtype.itemsize + target.dtype.itemsize
                           + mask.dtype.itemsize)
        partials = pl.pallas_call(
            kernel,
            out_shape=jax.ShapeDtypeStruct((num_blocks * SUBLANES, LANES),
                                           jnp.float32),
            grid_spec=pltpu.PrefetchScalarGridSpec(
                num_scalar_prefetch=0,
                grid=(num_blocks,),
                in_specs=[in_spec, in_spec, in_spec],
                out_specs=pl.BlockSpec((SUBLANES, LANES), lambda i: (i, 0)),
            ),
            compiler_params=pltpu.CompilerParams(
                dimension_semantics=("parallel",),      # megacore split on v7x
                vmem_limit_bytes=VMEM_LIMIT_BYTES),
            cost_estimate=pl.CostEstimate(
                flops=6 * main,
                transcendentals=main,
                bytes_accessed=bytes_in + num_blocks * SUBLANES * LANES * 4),
        )(slab(pred_f), slab(target_f), slab(mask_f))
        partial = jnp.sum(partials)

    if main < total:
        partial = partial + _masked_abs_diff_sum(
            pred_f[main:], target_f[main:], mask_f[main:])

    return partial / jnp.float32(total)


def alpha_loss_ref(pred, target, mask):
    p = jax.nn.sigmoid(pred.astype(jnp.float32))
    return jnp.mean(jnp.abs(p - target.astype(jnp.float32))
                    * mask.astype(jnp.float32))


def _check(name, got, want, rtol=1e-5, atol=1e-6):
    assert jnp.allclose(got, want, rtol=rtol, atol=atol), (name, got, want)


if __name__ == "__main__":
    key = jax.random.PRNGKey(0)
    k1, k2, k3 = jax.random.split(key, 3)

    def make(shape, pred_dtype=jnp.float32):
        pred = jax.random.normal(k1, shape, dtype=jnp.float32).astype(pred_dtype)
        target = jax.random.uniform(k2, shape, dtype=jnp.float32)
        mask = (jax.random.uniform(k3, shape) > 0.3).astype(jnp.float32)
        return pred, target, mask

    # 1) Canonical small NCHW case (single block, single chunk).
    shape = (2, 4, 16, 16)
    p, t, m = make(shape)
    ref = jax.block_until_ready(alpha_loss_ref(p, t, m))
    loss = jax.block_until_ready(alpha_loss(p, t, m))
    _check("single_block", loss, ref)

    # 2) Multi-block parallel grid (forced small blocks) + outside combine.
    loss2 = jax.block_until_ready(alpha_loss(p, t, m, max_block_rows=8))
    _check("multi_block", loss2, ref)

    # 3) Boundary-masked last block (main_rows=24, block_rows=16).
    p3, t3, m3 = make((1, 3, 8, 128))
    _check("boundary_mask",
           jax.block_until_ready(alpha_loss(p3, t3, m3, max_block_rows=16)),
           jax.block_until_ready(alpha_loss_ref(p3, t3, m3)))

    # 4) Ragged total: kernel main region + plain-JAX tail (<128 elements).
    p4, t4, m4 = make((2, 3, 17, 19))
    _check("ragged_tail",
           jax.block_until_ready(alpha_loss(p4, t4, m4)),
           jax.block_until_ready(alpha_loss_ref(p4, t4, m4)))

    # 5) Chunked in-kernel accumulation (block_rows=512, chunk=256) with a
    #    masked boundary chunk in the last block.
    p5, t5, m5 = make((2, 4, 64, 129))
    _check("chunked_blocks",
           jax.block_until_ready(alpha_loss(p5, t5, m5)),
           jax.block_until_ready(alpha_loss_ref(p5, t5, m5)))

    # 6) Large-slab rule: >=4 parallel grid steps (main_rows=1536 -> 6 blocks).
    p6, t6, m6 = make((1, 3, 256, 256))
    _check("four_plus_blocks",
           jax.block_until_ready(alpha_loss(p6, t6, m6)),
           jax.block_until_ready(alpha_loss_ref(p6, t6, m6)))

    # 7) Narrow-dtype pred (bf16): row alignment bumps to the native 16-row tile.
    p7, t7, m7 = make((2, 4, 16, 16), pred_dtype=jnp.bfloat16)
    _check("bf16_pred",
           jax.block_until_ready(alpha_loss(p7, t7, m7)),
           jax.block_until_ready(alpha_loss_ref(p7, t7, m7)))

    print("KERNEL_OK")
</pallas_src>

<mosaic_0001>
module attributes {stable_mosaic.version = 11 : i64} {
  func.func @_alpha_loss_kernel(%arg0: i32, %arg1: memref<16x128xf32, #tpu.memory_space<vmem>>, %arg2: memref<16x128xf32, #tpu.memory_space<vmem>>, %arg3: memref<16x128xf32, #tpu.memory_space<vmem>>, %arg4: memref<8x128xf32, #tpu.memory_space<vmem>>) attributes {dimension_semantics = [#tpu.dimension_semantics<parallel>], iteration_bounds = array<i64: 1>, scalar_prefetch = 0 : i64, scratch_operands = 0 : i64, tpu.core_type = #tpu.core_type<tc>, window_params = [{transform_indices = @transform_0, window_bounds = array<i64: 16, 128>}, {transform_indices = @transform_1, window_bounds = array<i64: 16, 128>}, {transform_indices = @transform_2, window_bounds = array<i64: 16, 128>}, {transform_indices = @transform_3, window_bounds = array<i64: 8, 128>}]} {
    %c0 = arith.constant 0 : index
    %c0_0 = arith.constant 0 : index
    %0 = vector.load %arg1[%c0, %c0_0] : memref<16x128xf32, #tpu.memory_space<vmem>>, vector<16x128xf32>
    %c0_1 = arith.constant 0 : index
    %c0_2 = arith.constant 0 : index
    %1 = vector.load %arg2[%c0_1, %c0_2] : memref<16x128xf32, #tpu.memory_space<vmem>>, vector<16x128xf32>
    %c0_3 = arith.constant 0 : index
    %c0_4 = arith.constant 0 : index
    %2 = vector.load %arg3[%c0_3, %c0_4] : memref<16x128xf32, #tpu.memory_space<vmem>>, vector<16x128xf32>
    %3 = arith.negf %0 : vector<16x128xf32>
    %4 = math.exp %3 : vector<16x128xf32>
    %cst = arith.constant 1.000000e+00 : f32
    %5 = vector.broadcast %cst : f32 to vector<16x128xf32>
    %6 = arith.addf %5, %4 : vector<16x128xf32>
    %7 = arith.divf %5, %6 : vector<16x128xf32>
    %8 = arith.subf %7, %1 : vector<16x128xf32>
    %9 = math.absf %8 : vector<16x128xf32>
    %10 = arith.mulf %9, %2 : vector<16x128xf32>
    %11 = vector.shape_cast %10 : vector<16x128xf32> to vector<2x8x128xf32>
    %cst_5 = arith.constant dense<0.000000e+00> : vector<8x128xf32>
    %12 = vector.multi_reduction <add>, %11, %cst_5 [0] : vector<2x8x128xf32> to vector<8x128xf32>
    %c0_6 = arith.constant 0 : index
    %c0_7 = arith.constant 0 : index
    %13 = vector.load %arg4[%c0_6, %c0_7] : memref<8x128xf32, #tpu.memory_space<vmem>>, vector<8x128xf32>
    tpu.vector_store %arg4[%c0_6, %c0_7], %12 {strides = array<i32>} : memref<8x128xf32, #tpu.memory_space<vmem>>, vector<8x128xf32>,
    return
  }
  func.func @transform_0(%arg0: i32) -> (i32, i32) {
    %c0_i32 = arith.constant 0 : i32
    %c0_i32_0 = arith.constant 0 : i32
    return %arg0, %c0_i32 : i32, i32
  }
  func.func @transform_1(%arg0: i32) -> (i32, i32) {
    %c0_i32 = arith.constant 0 : i32
    %c0_i32_0 = arith.constant 0 : i32
    return %arg0, %c0_i32 : i32, i32
  }
  func.func @transform_2(%arg0: i32) -> (i32, i32) {
    %c0_i32 = arith.constant 0 : i32
    %c0_i32_0 = arith.constant 0 : i32
    return %arg0, %c0_i32 : i32, i32
  }
  func.func @transform_3(%arg0: i32) -> (i32, i32) {
    %c0_i32 = arith.constant 0 : i32
    %c0_i32_0 = arith.constant 0 : i32
    return %arg0, %c0_i32 : i32, i32
  }
}

</mosaic_0001>

<bundles_post_ra>
// kernel: tpu_custom_call.1
= control target key start
LH: loop header
LB: loop body
LE: loop exit
PB: predicated region body
PF: predicated region fallthrough
CT: control target
= control target key end

     0   :  { %8 = vsyncpa [#allocation3], 0  ;;  %s298_s0 = inlined_call_operand.hbm [shape: f32[16,128], index: 0, kind: input, shape index: {}]   ;;  %s299_s1 = inlined_call_operand.hbm [shape: f32[16,128], index: 1, kind: input, shape index: {}]   ;;  %s300_s2 = inlined_call_operand.hbm [shape: f32[16,128], index: 2, kind: input, shape index: {}]   ;;  %s301_s3 = inlined_call_operand.hbm [shape: f32[8,128], index: 3, kind: output, shape index: {}]  }
   0x1   :  { %9 = vsyncpa [#allocation6], 0 }
   0x2   :  { %10 = vsyncpa [#allocation4], 0  ;;  %s208_s12 = smov [#allocation5]   ;;  %s209_s14 = smov [#allocation2]  }
   0x3   :  { %s28_s13 = sshll.u32 %s208_s12, 4  ;;  %s16_s15 = sshll.u32 %s209_s14, 4  ;;  %s29_s13 = int_to_ptr.vmem [resolvable:$true] %s28_s13  ;;  %s234_s15 = int_to_ptr.vmem [resolvable:$true] %s16_s15 }
   0x4   :  { %s114_s18 = scalar_lea.hbm %s299_s1, 256 }
   0x5   :  { %p115_p0 = scmp.ne.s32.totalorder %s299_s1, %s114_s18  ;;  %p118_p1 = scmp.lt.u32.totalorder %s114_s18, %s299_s1 }
   0x7   :  { %p120_p2 = pnand %p118_p1, %p115_p0 }
   0x9   :  { %123 = shalt.err (!%p120_p2)
}
   0xa   :  { %s124_s23 = scalar_lea.vmem %s29_s13, 256  ;;  %p129_p4 = scmp.lt.s32.totalorder %s29_s13, %s29_s13 }
   0xb   :  { %p125_p3 = scmp.ne.s32.totalorder %s29_s13, %s124_s23  ;;  %p130_p5 = scmp.lt.s32.totalorder %s124_s23, %s124_s23 }
   0xd   :  { %p131_p6 = por %p130_p5, %p129_p4 }
   0xf   :  { %p132_p7 = pnand %p131_p6, %p125_p3 }
  0x11   :  { %135 = shalt.err (!%p132_p7)
}
  0x12   :  { %s210_s24 = smov 128   ;;  %s211_s25 = smov 8  }
  0x13   :  { %34 = dma.hbm_to_vmem [thread:$0]  %s299_s1, 256, %s29_s13, [#allocation6], %s210_s24, %s210_s24, %s211_s25  }
  0x14   :  { %s136_s30 = scalar_lea.hbm %s298_s0, 256 }
  0x15   :  { %p137_p8 = scmp.ne.s32.totalorder %s298_s0, %s136_s30  ;;  %p140_p9 = scmp.lt.u32.totalorder %s136_s30, %s298_s0 }
  0x17   :  { %p142_p10 = pnand %p140_p9, %p137_p8 }
  0x19   :  { %145 = shalt.err (!%p142_p10)
}
  0x1a   :  { %s146_s8 = scalar_lea.vmem %s234_s15, 256  ;;  %p151_p12 = scmp.lt.s32.totalorder %s234_s15, %s234_s15 }
  0x1b   :  { %p147_p11 = scmp.ne.s32.totalorder %s234_s15, %s146_s8  ;;  %p152_p13 = scmp.lt.s32.totalorder %s146_s8, %s146_s8 }
  0x1d   :  { %p153_p0 = por %p152_p13, %p151_p12 }
  0x1f   :  { %p154_p1 = pnand %p153_p0, %p147_p11 }
  0x21   :  { %157 = shalt.err (!%p154_p1)
}
  0x22   :  { %22 = dma.hbm_to_vmem [thread:$0]  %s298_s0, 256, %s234_s15, [#allocation3], %s210_s24, %s210_s24, %s211_s25  }
  0x23   :  { %s212_s10 = smov [#allocation7]   ;;  %s158_s14 = scalar_lea.hbm %s300_s2, 256 }
  0x24   :  { %s40_s11 = sshll.u32 %s212_s10, 4  ;;  %p159_p2 = scmp.ne.s32.totalorder %s300_s2, %s158_s14  ;;  %s41_s11 = int_to_ptr.vmem [resolvable:$true] %s40_s11 }
  0x25   :  { %p162_p3 = scmp.lt.u32.totalorder %s158_s14, %s300_s2 }
  0x27   :  { %p164_p4 = pnand %p162_p3, %p159_p2 }
  0x29   :  { %167 = shalt.err (!%p164_p4)
}
  0x2a   :  { %s168_s20 = scalar_lea.vmem %s41_s11, 256  ;;  %p173_p6 = scmp.lt.s32.totalorder %s41_s11, %s41_s11 }
  0x2b   :  { %p169_p5 = scmp.ne.s32.totalorder %s41_s11, %s168_s20  ;;  %p174_p7 = scmp.lt.s32.totalorder %s168_s20, %s168_s20 }
  0x2d   :  { %p175_p8 = por %p174_p7, %p173_p6 }
  0x2f   :  { %p176_p9 = pnand %p175_p8, %p169_p5 }
  0x31   :  { %179 = shalt.err (!%p176_p9)
}
  0x32   :  { %46 = dma.hbm_to_vmem [thread:$0]  %s300_s2, 256, %s41_s11, [#allocation6], %s210_s24, %s210_s24, %s211_s25  }
  0x33   :  { %202 = dma.done.wait [#allocation3], 256  }
  0x34   :  { %203 = vsyncadd [#allocation3], 4294967040 }
  0x35   :  { %204 = dma.done.wait [#allocation6], 512  }
  0x36   :  { %205 = vsyncadd [#allocation6], 4294966784  ;;  %v56_v0 = vld [vmem:[#allocation2] sm:$0xff]  ;;  %v57_v1 = vld [vmem:[#allocation2 + $0x8] sm:$0xff]  ;;  %s213_s2 = smov [#allocation8]  }
  0x37   :  { %v98_v2 = vmul.f32 -1.442695, %v56_v0  ;;  %v99_v3 = vmul.f32 -1.442695, %v57_v1  ;;  %v58_v8 = vld [vmem:[#allocation5] sm:$0xff]  ;;  %v59_v9 = vld [vmem:[#allocation5 + $0x8] sm:$0xff] }
  0x38   :  { %v60_v13 = vld [vmem:[#allocation7] sm:$0xff]  ;;  %v61_v15 = vld [vmem:[#allocation7 + $0x8] sm:$0xff]  ;;  %s88_s21 = sshll.u32 %s213_s2, 4  ;;  %s89_s21 = int_to_ptr.vmem [resolvable:$true] %s88_s21 }
  0x39   :  { %106 = vpow2.f32 %v98_v2  ;;  %s180_s22 = scalar_lea.vmem %s89_s21, 128  ;;  %p185_p11 = scmp.lt.s32.totalorder %s89_s21, %s89_s21 }
  0x3a   :  { %108 = vpow2.f32 %v99_v3  ;;  %p181_p10 = scmp.ne.s32.totalorder %s89_s21, %s180_s22  ;;  %p186_p12 = scmp.lt.s32.totalorder %s180_s22, %s180_s22 }
  0x3c   :  { %p187_p13 = por %p186_p12, %p185_p11 }
  0x3e   :  { %p188_p0 = pnand %p187_p13, %p181_p10 }
  0x43   :  { %v107_v4 = vpop.eup %106 }
  0x44   :  { %v109_v5 = vpop.eup %108  ;;  %v68_v6 = vadd.f32 1.0, %v107_v4 }
  0x45   :  { %v69_v7 = vadd.f32 1.0, %v109_v5 }
  0x46   :  { %110 = vrcp.f32 %v68_v6 }
  0x47   :  { %112 = vrcp.f32 %v69_v7 }
  0x50   :  { %v111_v10 = vpop.eup %110 }
  0x51   :  { %v113_v11 = vpop.eup %112  ;;  %v74_v12 = vsub.f32 %v111_v10, %v58_v8 }
  0x52   :  { %v75_v14 = vsub.f32 %v113_v11, %v59_v9 }
  0x53   :  { %v76_v16 = vand.u32 2147483647, %v74_v12 }
  0x54   :  { %v77_v17 = vand.u32 2147483647, %v75_v14 }
  0x55   :  { %v78_v18 = vmul.f32 %v76_v16, %v60_v13 }
  0x56   :  { %v79_v19 = vmul.f32 %v77_v17, %v61_v15 }
  0x58   :  { %v80_v20 = vadd.f32 %v79_v19, %v78_v18 }
  0x5a   :  { %81 = vst [vmem:[#allocation8] sm:$0xff] %v80_v20 }
  0x5b   :  { %191 = shalt.err (!%p188_p0)
}
  0x5c   :  { %s192_s25 = scalar_lea.hbm %s301_s3, 128 }
  0x5d   :  { %p193_p1 = scmp.ne.s32.totalorder %s301_s3, %s192_s25  ;;  %p196_p2 = scmp.lt.u32.totalorder %s192_s25, %s301_s3 }
  0x5f   :  { %p198_p3 = pnand %p196_p2, %p193_p1 }
  0x61   :  { %201 = shalt.err (!%p198_p3)
}
  0x62   :  { %91 = dma.vmem_to_hbm [thread:$0]  %s89_s21, 128, %s301_s3, [#allocation4]  }
  0x63   :  { %206 = dma.done.wait [#allocation4], 128  }
  0x64   :  { %207 = vsyncadd [#allocation4], 4294967168 }
  0x65   :  { %95 = vsyncpa [#allocation3], 1 }
  0x66   :  { %96 = vsyncpa [#allocation6], 1 }
  0x67   :  { %97 = vsyncpa [#allocation4], 1 }

</bundles_post_ra>
